<compile_context>
chip_gen: v5e
topology: v5e:2x2
jax: 0.10.0
libtpu: 0.0.40
codegen_flags: <defaults>
</compile_context>

<pallas_src>
import math
import functools

import jax
import jax.numpy as jnp
from jax.experimental import pallas as pl
from jax.experimental.pallas import tpu as pltpu


def _round_up(x: int, m: int) -> int:
    return int(pl.cdiv(x, m) * m)


def _rff_kernel(x_ref, w_ref, b_ref, o_ref, *, scale):
    # MXU matmul with f32 accumulation, then bias / cos / scale on VPU+EUP.
    z = jnp.dot(x_ref[...], w_ref[...], preferred_element_type=jnp.float32)
    z = z + b_ref[...]                            # (tm, tf) + (1, tf) broadcast
    o_ref[...] = (scale * jnp.cos(z)).astype(o_ref.dtype)


def feature_map_forward(x, w, b, *, block_rows=None, block_features=None):
    """phi(x) = sqrt(2/feature_dim) * cos(x @ W + b).

    x : (..., in_dim) -> (..., feature_dim), same float dtype as x.
    """
    in_dim = x.shape[-1]
    feature_dim = w.shape[-1]
    lead = x.shape[:-1]
    n = int(math.prod(lead)) if lead else 1
    x2d = x.reshape(n, in_dim)

    x_bytes = jnp.dtype(x.dtype).itemsize
    w_bytes = jnp.dtype(w.dtype).itemsize
    o_bytes = x_bytes

    # ---- VMEM budget (per-generation: v5e/v6e 128 MiB, v7x 64 MiB) ----------
    try:
        vmem_cap = int(pltpu.get_tpu_info().vmem_capacity_bytes)
    except Exception:  # conservative fallback (v7x-sized)
        vmem_cap = 64 * 1024 * 1024
    vmem_limit = vmem_cap // 2          # leave headroom for compiler scratch
    budget = int(vmem_limit * 0.8)

    # ---- lane-dense feature tiling (multiple of 128) -------------------------
    f_pad = _round_up(feature_dim, 128)
    if block_features is None:
        block_features = min(f_pad, 512)
    block_features = min(f_pad, max(128, _round_up(block_features, 128)))

    def _tile_bytes(br, tf):
        # worst case: every operand double-buffered by the pipeline
        return (2 * br * in_dim * x_bytes          # x tile
                + 2 * br * tf * o_bytes            # output tile
                + 2 * in_dim * tf * w_bytes        # W tile
                + 2 * tf * w_bytes)                # b tile

    # shrink the feature tile if even an 8-row step would not fit
    while block_features > 128 and _tile_bytes(8, block_features) > budget:
        block_features -= 128

    # ---- row tiling (multiple of 8, sized against the VMEM budget) ----------
    n_cap = _round_up(max(n, 1), 8)
    if block_rows is None:
        chosen = 8
        for cand in (2048, 1024, 512, 256, 128, 64, 32, 16, 8):
            if _tile_bytes(cand, block_features) <= budget:
                chosen = cand
                break
        block_rows = min(chosen, n_cap)
    block_rows = _round_up(block_rows, 8)

    # ---- wrapper-side padding (no divisibility requirements on callers) -----
    n_pad = _round_up(n, block_rows)
    if n_pad != n:
        x2d = jnp.pad(x2d, ((0, n_pad - n), (0, 0)))
    if f_pad != feature_dim:
        w = jnp.pad(w, ((0, 0), (0, f_pad - feature_dim)))
        b = jnp.pad(b, (0, f_pad - feature_dim))
    b2d = b.reshape(1, f_pad)

    # feature axis first (slow) so W/b blocks are reused across row steps
    grid = (f_pad // block_features, n_pad // block_rows)

    scale = math.sqrt(2.0 / feature_dim)   # scale uses the *real* feature_dim
    kernel = functools.partial(_rff_kernel, scale=scale)

    cost = pl.CostEstimate(
        flops=2 * n * in_dim * feature_dim,
        transcendentals=n * feature_dim,
        bytes_accessed=(x_bytes * n * in_dim
                        + w_bytes * in_dim * feature_dim
                        + w_bytes * feature_dim
                        + o_bytes * n * feature_dim),
    )

    out2d = pl.pallas_call(
        kernel,
        out_shape=jax.ShapeDtypeStruct((n_pad, f_pad), x.dtype),
        grid_spec=pltpu.PrefetchScalarGridSpec(
            num_scalar_prefetch=0,
            grid=grid,
            in_specs=[
                pl.BlockSpec((block_rows, in_dim), lambda j, i: (i, 0)),
                pl.BlockSpec((in_dim, block_features), lambda j, i: (0, j)),
                pl.BlockSpec((1, block_features), lambda j, i: (0, j)),
            ],
            out_specs=pl.BlockSpec((block_rows, block_features),
                                   lambda j, i: (i, j)),
        ),
        compiler_params=pltpu.CompilerParams(
            dimension_semantics=("parallel", "parallel"),
            vmem_limit_bytes=int(vmem_limit),
        ),
        cost_estimate=cost,
    )(x2d, w, b2d)

    out2d = out2d[:n, :feature_dim]
    return out2d.reshape(*lead, feature_dim)


def _reference(x, w, b):
    feature_dim = w.shape[-1]
    scale = math.sqrt(2.0 / feature_dim)
    return (scale * jnp.cos(x @ w + b)).astype(x.dtype)


if __name__ == "__main__":
    key = jax.random.PRNGKey(0)

    # Case 1: shapes consistent with the module (in_dim=32 -> feature_dim=64)
    batch, seq, in_dim, feature_dim = 2, 8, 32, 64
    kx, kw, kb, k2 = jax.random.split(key, 4)
    x = jax.random.normal(kx, (batch, seq, in_dim), dtype=jnp.float32)
    w = jax.random.normal(kw, (in_dim, feature_dim), dtype=jnp.float32)
    b = jax.random.uniform(kb, (feature_dim,), dtype=jnp.float32,
                           minval=0.0, maxval=2.0 * math.pi)

    out = jax.block_until_ready(feature_map_forward(x, w, b))
    ref = _reference(x, w, b)
    assert out.shape == (batch, seq, feature_dim)
    assert jnp.allclose(out, ref, atol=1e-5, rtol=1e-5), (
        float(jnp.max(jnp.abs(out - ref))))

    # Case 2: awkward (non-multiple-of-8 rows / non-multiple-of-128 features)
    # to exercise the wrapper-side padding path.
    kx2, kw2, kb2 = jax.random.split(k2, 3)
    x2 = jax.random.normal(kx2, (3, 5, 32), dtype=jnp.float32)
    w2 = jax.random.normal(kw2, (32, 96), dtype=jnp.float32)
    b2 = jax.random.uniform(kb2, (96,), dtype=jnp.float32,
                            minval=0.0, maxval=2.0 * math.pi)
    out2 = jax.block_until_ready(feature_map_forward(x2, w2, b2))
    ref2 = _reference(x2, w2, b2)
    assert out2.shape == (3, 5, 96)
    assert jnp.allclose(out2, ref2, atol=1e-5, rtol=1e-5), (
        float(jnp.max(jnp.abs(out2 - ref2))))

    print("KERNEL_OK")
</pallas_src>

<mosaic_0001>
module attributes {stable_mosaic.version = 11 : i64} {
  func.func @_rff_kernel(%arg0: i32, %arg1: i32, %arg2: memref<16x32xf32, #tpu.memory_space<vmem>>, %arg3: memref<32x128xf32, #tpu.memory_space<vmem>>, %arg4: memref<1x128xf32, #tpu.memory_space<vmem>>, %arg5: memref<16x128xf32, #tpu.memory_space<vmem>>) attributes {dimension_semantics = [#tpu.dimension_semantics<parallel>, #tpu.dimension_semantics<parallel>], iteration_bounds = array<i64: 1, 1>, scalar_prefetch = 0 : i64, scratch_operands = 0 : i64, tpu.core_type = #tpu.core_type<tc>, window_params = [{transform_indices = @transform_0, window_bounds = array<i64: 16, 32>}, {transform_indices = @transform_1, window_bounds = array<i64: 32, 128>}, {transform_indices = @transform_2, window_bounds = array<i64: 1, 128>}, {transform_indices = @transform_3, window_bounds = array<i64: 16, 128>}]} {
    %c0 = arith.constant 0 : index
    %c0_0 = arith.constant 0 : index
    %0 = vector.load %arg2[%c0, %c0_0] : memref<16x32xf32, #tpu.memory_space<vmem>>, vector<16x32xf32>
    %c0_1 = arith.constant 0 : index
    %c0_2 = arith.constant 0 : index
    %1 = vector.load %arg3[%c0_1, %c0_2] : memref<32x128xf32, #tpu.memory_space<vmem>>, vector<32x128xf32>
    %cst = arith.constant dense<0.000000e+00> : vector<16x128xf32>
    %2 = tpu.matmul %0, %1, %cst {dimension_numbers = #tpu.dot_dimension_numbers<[1], [0], [0], [1], [0, 0, 1, 1], [], []>} : vector<16x32xf32>, vector<32x128xf32>, vector<16x128xf32> -> vector<16x128xf32>
    %c0_3 = arith.constant 0 : index
    %c0_4 = arith.constant 0 : index
    %3 = vector.load %arg4[%c0_3, %c0_4] : memref<1x128xf32, #tpu.memory_space<vmem>>, vector<1x128xf32>
    %4 = vector.broadcast %3 : vector<1x128xf32> to vector<16x128xf32>
    %5 = arith.addf %2, %4 : vector<16x128xf32>
    %6 = math.cos %5 : vector<16x128xf32>
    %cst_5 = arith.constant 0.176776692 : f32
    %7 = vector.broadcast %cst_5 : f32 to vector<16x128xf32>
    %8 = arith.mulf %7, %6 : vector<16x128xf32>
    %c0_6 = arith.constant 0 : index
    %c0_7 = arith.constant 0 : index
    %9 = vector.load %arg5[%c0_6, %c0_7] : memref<16x128xf32, #tpu.memory_space<vmem>>, vector<16x128xf32>
    tpu.vector_store %arg5[%c0_6, %c0_7], %8 {strides = array<i32>} : memref<16x128xf32, #tpu.memory_space<vmem>>, vector<16x128xf32>,
    return
  }
  func.func @transform_0(%arg0: i32, %arg1: i32) -> (i32, i32) {
    %c0_i32 = arith.constant 0 : i32
    %c0_i32_0 = arith.constant 0 : i32
    return %arg1, %c0_i32 : i32, i32
  }
  func.func @transform_1(%arg0: i32, %arg1: i32) -> (i32, i32) {
    %c0_i32 = arith.constant 0 : i32
    %c0_i32_0 = arith.constant 0 : i32
    return %c0_i32, %arg0 : i32, i32
  }
  func.func @transform_2(%arg0: i32, %arg1: i32) -> (i32, i32) {
    %c0_i32 = arith.constant 0 : i32
    %c0_i32_0 = arith.constant 0 : i32
    return %c0_i32, %arg0 : i32, i32
  }
  func.func @transform_3(%arg0: i32, %arg1: i32) -> (i32, i32) {
    %c0_i32 = arith.constant 0 : i32
    return %arg1, %arg0 : i32, i32
  }
}

</mosaic_0001>

<bundles_post_ra>
// kernel: tpu_custom_call.1
= control target key start
LH: loop header
LB: loop body
LE: loop exit
PB: predicated region body
PF: predicated region fallthrough
CT: control target
= control target key end

     0   :  { %8 = vsyncpa [#allocation3], 0  ;;  %s756_s0 = inlined_call_operand.hbm [shape: f32[16,32], index: 0, kind: input, shape index: {}]   ;;  %s757_s1 = inlined_call_operand.hbm [shape: f32[32,128], index: 1, kind: input, shape index: {}]   ;;  %s758_s2 = inlined_call_operand.vmem [shape: f32[1,128], index: 2, kind: input, shape index: {}]   ;;  %s759_s3 = inlined_call_operand.hbm [shape: f32[16,128], index: 3, kind: output, shape index: {}]  }
   0x1   :  { %9 = vsyncpa [#allocation6], 0 }
   0x2   :  { %10 = vsyncpa [#allocation4], 0  ;;  %s15_s14 = sshll.u32 %s756_s0, 4  ;;  %s522_s15 = smov [#allocation2]   ;;  %s16_s14 = int_to_ptr.hbm [resolvable:$true] %s15_s14 }
   0x3   :  { %s17_s16 = sshll.u32 %s522_s15, 4  ;;  %s28_s19 = sshll.u32 %s757_s1, 4  ;;  %s18_s16 = int_to_ptr.vmem [resolvable:$true] %s17_s16  ;;  %s29_s19 = int_to_ptr.hbm [resolvable:$true] %s28_s19 }
   0x4   :  { %s523_s20 = smov 128   ;;  %s524_s21 = smov 8  }
   0x5   :  { %23 = dma.hbm_to_vmem [thread:$0]  %s16_s14, 256, %s18_s16, [#allocation3], %s523_s20, %s523_s20, %s524_s21  }
   0x6   :  { %s525_s22 = smov [#allocation5]  }
   0x7   :  { %s30_s23 = sshll.u32 %s525_s22, 4  ;;  %s31_s23 = int_to_ptr.vmem [resolvable:$true] %s30_s23 }
   0x8   :  { %36 = dma.hbm_to_vmem [thread:$0]  %s29_s19, 512, %s31_s23, [#allocation6], %s523_s20, %s523_s20, %s524_s21  }
   0x9   :  { %516 = dma.done.wait [#allocation3], 256  }
   0xa   :  { %517 = vsyncadd [#allocation3], 4294967040 }
   0xb   :  { %518 = dma.done.wait [#allocation6], 512  }
   0xc   :  { %519 = vsyncadd [#allocation6], 4294966784  ;;  %v52_v0 = vld [vmem:[#allocation5 + $0x18] sm:$0xff]  ;;  %v51_v1 = vld [vmem:[#allocation5 + $0x10] sm:$0xff]  ;;  %vm57_vm0 = vcmask 261120   ;;  %s405_s27 = sshll.u32 %s759_s3, 4  ;;  %s406_s27 = int_to_ptr.hbm [resolvable:$true] %s405_s27 }
   0xd   :  { %76 = vmatpush.msra.mxu0 %v52_v0  ;;  %427 = vmatpush.msra.mxu1 %v52_v0  ;;  %v50_v2 = vld [vmem:[#allocation5 + $0x8] sm:$0xff]  ;;  %v49_v3 = vld [vmem:[#allocation5] sm:$0xff]  ;;  %v47_v4 = vld [vmem:[#allocation2] sm:$0xff]  ;;  %v526_v34 = vmov 683565275  }
   0xe   :  { %v48_v5 = vld [vmem:[#allocation2 + $0x8] sm:$0xff]  ;;  %v443_v6 = vld [vmem:[%s758_s2] ss:$0 sm:$0xff]  ;;  %v527_v36 = vmov 2475754826   ;;  %s533_s2 = smov [#allocation7]  }
   0xf   :  { %77 = vmatpush.msra.mxu0 %v51_v1  ;;  %428 = vmatpush.msra.mxu1 %v51_v1  ;;  %v528_v40 = vmov 2131351028   ;;  %v529_v43 = vmov 2102212464   ;;  %v530_v46 = vmov 920167782  }
  0x10   :  { %v531_v49 = vmov 1326507024   ;;  %s403_s24 = sshll.u32 %s533_s2, 4  ;;  %s404_s24 = int_to_ptr.vmem [resolvable:$true] %s403_s24 }
  0x11   :  { %78 = vmatpush.msra.mxu0 %v50_v2  ;;  %429 = vmatpush.msra.mxu1 %v50_v2 }
  0x13   :  { %79 = vmatpush.msra.mxu0 %v49_v3  ;;  %430 = vmatpush.msra.mxu1 %v49_v3 }
  0x14   :  { %419 = vmatmul.msk.f32.vlgmr.msra.gmra.mxu0 %vm57_vm0, %v47_v4  ;;  %420 = vmatmul.msk.f32.vlgmr.msra.gmra.mxu1 %vm57_vm0, %v48_v5 }
  0x91   :  { %v81_v7 = vpop.f32.mrf.mxu0  ;;  %v84_v8 = vpop.f32.mrf.mxu1 }
  0x92   :  { %v569_v9 = vadd.f32 %v443_v6, %v81_v7  ;;  %v571_v10 = vadd.f32 %v443_v6, %v84_v8 }
  0x94   :  { %v87_v11 = vand.u32 2147483647, %v569_v9  ;;  %v90_v12 = vand.u32 2139095040, %v569_v9  ;;  %v241_v13 = vand.u32 2147483647, %v571_v10  ;;  %v244_v14 = vand.u32 2139095040, %v571_v10 }
  0x96   :  { %v91_v15 = vshrl.u32 %v90_v12, 23  ;;  %v94_v16 = vand.u32 8388607, %v87_v11  ;;  %v245_v17 = vshrl.u32 %v244_v14, 23  ;;  %v248_v20 = vand.u32 8388607, %v241_v13 }
  0x98   :  { %v421_v18 = vadd.s32 4294967169, %v91_v15  ;;  %v95_v19 = vor.u32 8388608, %v94_v16  ;;  %v424_v21 = vadd.s32 4294967169, %v245_v17  ;;  %v249_v25 = vor.u32 8388608, %v248_v20 }
  0x9a   :  { %v97_v22 = vadd.s32 1, %v421_v18  ;;  %v251_v23 = vadd.s32 1, %v424_v21  ;;  %v581_v24 = vshll.u32 %v95_v19, 8  ;;  %v588_v32 = vshll.u32 %v249_v25, 8 }
  0x9c   :  { %vm98_vm1 = vcmp.gt.s32.totalorder %v97_v22, 0  ;;  %vm252_vm2 = vcmp.gt.s32.totalorder %v251_v23, 0  ;;  %v584_v30 = vand.u32 65535, %v581_v24  ;;  %v137_v38 = vshrl.u32 %v581_v24, 16 }
  0x9d   :  { %v99_v26 = vsel %vm98_vm1, %v97_v22, 0  ;;  %v253_v28 = vsel %vm252_vm2, %v251_v23, 0 }
  0x9e   :  { %v101_v27 = vand.u32 31, %v99_v26  ;;  %v586_v31 = vand.u32 31, %v253_v28  ;;  %v590_v33 = vshrl.u32 %v99_v26, 5  ;;  %v628_v17 = vshrl.u32 %v253_v28, 5 }
  0xa0   :  { %v102_v29 = vsub.s32 32, %v101_v27  ;;  %v104_v35 = vshll.u32 %v526_v34, %v101_v27  ;;  %v107_v37 = vshll.u32 %v527_v36, %v101_v27  ;;  %v110_v42 = vshll.u32 %v528_v40, %v101_v27 }
  0xa1   :  { %v113_v45 = vshll.u32 %v529_v43, %v101_v27  ;;  %v116_v48 = vshll.u32 %v530_v46, %v101_v27  ;;  %v600_v54 = vsub.s32 32, %v586_v31  ;;  %vm119_vm3 = vcmp.lt.s32.totalorder %v590_v33, 1 }
  0xa2   :  { %v105_v39 = vshrl.u32 %v527_v36, %v102_v29  ;;  %v108_v41 = vshrl.u32 %v528_v40, %v102_v29  ;;  %v111_v44 = vshrl.u32 %v529_v43, %v102_v29  ;;  %v114_v47 = vshrl.u32 %v530_v46, %v102_v29 }
  0xa3   :  { %v117_v50 = vshrl.u32 %v531_v49, %v102_v29  ;;  %vm120_vm4 = vcmp.lt.s32.totalorder %v590_v33, 2  ;;  %v103_v57 = vshrl.u32 %v526_v34, %v102_v29  ;;  %vm122_vm5 = vcmp.lt.s32.totalorder %v590_v33, 4 }
  0xa4   :  { %v106_v51 = vor.u32 %v105_v39, %v104_v35  ;;  %v109_v52 = vor.u32 %v108_v41, %v107_v37  ;;  %v112_v53 = vor.u32 %v111_v44, %v110_v42  ;;  %v115_v55 = vor.u32 %v114_v47, %v113_v45 }
  0xa5   :  { %v118_v56 = vor.u32 %v117_v50, %v116_v48  ;;  %vm121_vm6 = vcmp.lt.s32.totalorder %v590_v33, 3  ;;  %v258_v62 = vshll.u32 %v526_v34, %v586_v31  ;;  %v259_v2 = vshrl.u32 %v527_v36, %v600_v54 }
  0xa6   :  { %v127_v58 = vsel %vm119_vm3, %v106_v51, %v109_v52  ;;  %v131_v59 = vsel %vm119_vm3, %v109_v52, %v112_v53  ;;  %v128_v60 = vsel %vm122_vm5, %v115_v55, 920167782  ;;  %v124_v63 = vsel %vm122_vm5, %v112_v53, 2102212464 }
  0xa7   :  { %v132_v61 = vsel %vm122_vm5, %v118_v56, 1326507024  ;;  %v129_v0 = vsel %vm121_vm6, %v112_v53, %v128_v60  ;;  %v261_v5 = vshll.u32 %v527_v36, %v586_v31  ;;  %v262_v6 = vshrl.u32 %v528_v40, %v600_v54 }
  0xa8   :  { %v133_v1 = vsel %vm121_vm6, %v115_v55, %v132_v61  ;;  %v130_v3 = vsel %vm120_vm4, %v127_v58, %v129_v0  ;;  %v123_v15 = vsel %vm119_vm3, %v103_v57, %v106_v51  ;;  %v125_v16 = vsel %vm121_vm6, %v109_v52, %v124_v63 }
  0xa9   :  { %v134_v4 = vsel %vm120_vm4, %v131_v59, %v133_v1  ;;  %v160_v12 = vand.u32 65535, %v130_v3  ;;  %v161_v14 = vshrl.u32 %v130_v3, 16  ;;  %v630_v18 = vor.u32 %v259_v2, %v258_v62 }
  0xaa   :  { %v138_v7 = vand.u32 65535, %v134_v4  ;;  %v139_v8 = vshrl.u32 %v134_v4, 16  ;;  %v633_v21 = vor.u32 %v262_v6, %v261_v5  ;;  %v265_v22 = vshrl.u32 %v529_v43, %v600_v54 }
  0xab   :  { %v163_v25 = vmul.u32 %v161_v14, %v584_v30  ;;  %v164_v26 = vmul.u32 %v160_v12, %v137_v38  ;;  %v264_v27 = vshll.u32 %v528_v40, %v586_v31  ;;  %v162_v35 = vmul.u32 %v160_v12, %v584_v30 }
  0xac   :  { %v141_v19 = vmul.u32 %v139_v8, %v584_v30  ;;  %v142_v20 = vmul.u32 %v138_v7, %v137_v38  ;;  %v140_v23 = vmul.u32 %v138_v7, %v584_v30  ;;  %v143_v29 = vmul.u32 %v139_v8, %v137_v38 }
  0xad   :  { %v165_v36 = vmul.u32 %v161_v14, %v137_v38  ;;  %v166_v42 = vshll.u32 %v163_v25, 16  ;;  %v168_v45 = vshll.u32 %v164_v26, 16  ;;  %v266_v47 = vor.u32 %v265_v22, %v264_v27 }
  0xae   :  { %v144_v28 = vshll.u32 %v141_v19, 16  ;;  %v145_v37 = vshrl.u32 %v141_v19, 16  ;;  %v146_v39 = vshll.u32 %v142_v20, 16  ;;  %v147_v41 = vshrl.u32 %v142_v20, 16 }
  0xaf   :  { %v532_v48 = vmov 0   ;;  %vm170_vm8 = vc.u32 %v162_v35, %v166_v42  ;;  %v172_v51 = vadd.s32 %v166_v42, %v162_v35  ;;  %v268_v40 = vshrl.u32 %v530_v46, %v600_v54 }
  0xb0   :  { %vm148_vm7 = vc.u32 %v140_v23, %v144_v28  ;;  %v150_v44 = vadd.s32 %v144_v28, %v140_v23  ;;  %v171_v30 = vsel %vm170_vm8, 1, %v532_v48  ;;  %v267_v38 = vshll.u32 %v529_v43, %v586_v31 }
  0xb1   :  { %v149_v50 = vsel %vm148_vm7, 1, %v532_v48  ;;  %v173_v55 = vadd.s32 %v171_v30, %v165_v36  ;;  %vm174_vm10 = vc.u32 %v172_v51, %v168_v45  ;;  %v270_v56 = vshll.u32 %v530_v46, %v586_v31 }
  0xb2   :  { %v151_v52 = vadd.s32 %v149_v50, %v143_v29  ;;  %vm152_vm9 = vc.u32 %v150_v44, %v146_v39  ;;  %v175_v58 = vsel %vm174_vm10, 1, %v532_v48  ;;  %v269_v59 = vor.u32 %v268_v40, %v267_v38 }
  0xb3   :  { %v153_v53 = vsel %vm152_vm9, 1, %v532_v48  ;;  %v271_v60 = vshrl.u32 %v531_v49, %v600_v54  ;;  %v167_v61 = vshrl.u32 %v163_v25, 16  ;;  %v169_v62 = vshrl.u32 %v164_v26, 16 }
  0xb4   :  { %v155_v57 = vadd.s32 %v153_v53, %v151_v52  ;;  %v653_v63 = vadd.s32 %v172_v51, %v168_v45  ;;  %v177_v0 = vadd.s32 %v175_v58, %v173_v55  ;;  %vm273_vm11 = vcmp.lt.s32.totalorder %v628_v17, 1 }
  0xb5   :  { %v272_v1 = vor.u32 %v271_v60, %v270_v56  ;;  %vm276_vm12 = vcmp.lt.s32.totalorder %v628_v17, 4  ;;  %vm275_vm13 = vcmp.lt.s32.totalorder %v628_v17, 3  ;;  %v281_v31 = vsel %vm273_vm11, %v630_v18, %v633_v21 }
  0xb6   :  { %v156_v43 = vadd.s32 %v155_v57, %v145_v37  ;;  %v178_v2 = vadd.s32 %v177_v0, %v167_v61  ;;  %v282_v46 = vsel %vm276_vm12, %v269_v59, 920167782  ;;  %vm274_vm14 = vcmp.lt.s32.totalorder %v628_v17, 2 }
  0xb7   :  { %v283_v3 = vsel %vm275_vm13, %v266_v47, %v282_v46  ;;  %v285_v4 = vsel %vm273_vm11, %v633_v21, %v266_v47  ;;  %v126_v5 = vsel %vm120_vm4, %v123_v15, %v125_v16  ;;  %v286_v8 = vsel %vm276_vm12, %v272_v1, 1326507024 }
  0xb8   :  { %v664_v49 = vadd.s32 %v156_v43, %v147_v41  ;;  %v179_v6 = vadd.s32 %v178_v2, %v169_v62  ;;  %v284_v7 = vsel %vm274_vm14, %v281_v31, %v283_v3  ;;  %v287_v12 = vsel %vm275_vm13, %v269_v59, %v286_v8 }
  0xb9   :  { %v290_v14 = vand.u32 65535, %v588_v32  ;;  %v314_v19 = vand.u32 65535, %v284_v7  ;;  %v288_v33 = vsel %vm274_vm14, %v285_v4, %v287_v12  ;;  %v291_v15 = vshrl.u32 %v588_v32, 16 }
  0xba   :  { %vm182_vm15 = vc.u32 %v664_v49, %v653_v63  ;;  %v183_v20 = vadd.s32 1, %v179_v6  ;;  %v315_v16 = vshrl.u32 %v284_v7, 16  ;;  %v180_v22 = vmul.u32 %v581_v24, %v126_v5 }
  0xbb   :  { %v292_v23 = vand.u32 65535, %v288_v33  ;;  %v293_v25 = vshrl.u32 %v288_v33, 16  ;;  %v318_v29 = vmul.u32 %v314_v19, %v291_v15  ;;  %v257_v35 = vshrl.u32 %v526_v34, %v600_v54 }
  0xbc   :  { %v184_v26 = vsel %vm182_vm15, %v183_v20, %v179_v6  ;;  %v317_v27 = vmul.u32 %v315_v16, %v290_v14  ;;  %v278_v39 = vsel %vm276_vm12, %v266_v47, 2102212464  ;;  %v316_v41 = vmul.u32 %v314_v19, %v290_v14 }
  0xbd   :  { %v185_v28 = vadd.s32 %v184_v26, %v180_v22  ;;  %v295_v36 = vmul.u32 %v293_v25, %v290_v14  ;;  %v296_v37 = vmul.u32 %v292_v23, %v291_v15  ;;  %v319_v42 = vmul.u32 %v315_v16, %v291_v15 }
  0xbe   :  { %v320_v44 = vshll.u32 %v317_v27, 16  ;;  %v294_v50 = vmul.u32 %v292_v23, %v290_v14  ;;  %v297_v24 = vmul.u32 %v293_v25, %v291_v15  ;;  %v322_v52 = vshll.u32 %v318_v29, 16 }
  0xbf   :  { %v186_v45 = vadd.s32 536870912, %v185_v28  ;;  %v298_v51 = vshll.u32 %v295_v36, 16  ;;  %v300_v40 = vshll.u32 %v296_v37, 16  ;;  %v277_v56 = vsel %vm273_vm11, %v257_v35, %v630_v18 }
  0xc0   :  { %vm324_vm0 = vc.u32 %v316_v41, %v320_v44  ;;  %v326_v30 = vadd.s32 %v320_v44, %v316_v41  ;;  %v279_v58 = vsel %vm275_vm13, %v633_v21, %v278_v39  ;;  %v321_v60 = vshrl.u32 %v317_v27, 16 }
  0xc1   :  { %v691_v38 = vshrl.u32 %v186_v45, 30  ;;  %vm302_vm1 = vc.u32 %v294_v50, %v298_v51  ;;  %v304_v34 = vadd.s32 %v298_v51, %v294_v50  ;;  %v325_v54 = vsel %vm324_vm0, 1, %v532_v48 }
  0xc2   :  { %v303_v53 = vsel %vm302_vm1, 1, %v532_v48  ;;  %v327_v47 = vadd.s32 %v325_v54, %v319_v42  ;;  %vm328_vm2 = vc.u32 %v326_v30, %v322_v52  ;;  %v299_v0 = vshrl.u32 %v295_v36, 16 }
  0xc3   :  { %v188_v55 = vshll.u32 %v691_v38, 30  ;;  %v305_v57 = vadd.s32 %v303_v53, %v297_v24  ;;  %vm306_vm3 = vc.u32 %v304_v34, %v300_v40  ;;  %v329_v61 = vsel %vm328_vm2, 1, %v532_v48 }
  0xc4   :  { %v307_v59 = vsel %vm306_vm3, 1, %v532_v48  ;;  %v331_v1 = vadd.s32 %v329_v61, %v327_v47  ;;  %v301_v2 = vshrl.u32 %v296_v37, 16  ;;  %v323_v31 = vshrl.u32 %v318_v29, 16 }
  0xc5   :  { %v189_v62 = vsub.s32 %v185_v28, %v188_v55  ;;  %v309_v43 = vadd.s32 %v307_v59, %v305_v57  ;;  %v280_v4 = vsel %vm274_vm14, %v277_v56, %v279_v58  ;;  %v330_v6 = vadd.s32 %v326_v30, %v322_v52 }
  0xc6   :  { %v332_v3 = vadd.s32 %v331_v1, %v321_v60  ;;  %v334_v14 = vmul.u32 %v588_v32, %v280_v4  ;;  %v181_v15 = vadd.s32 %v653_v63, %v664_v49  ;;  %vm89_vm8 = vcmp.lt.s32.totalorder %v569_v9, 0 }
  0xc7   :  { %vm190_vm4 = vcmp.lt.s32.totalorder %v189_v62, 0  ;;  %v191_v46 = vsub.s32 0, %v189_v62  ;;  %v310_v18 = vadd.s32 %v309_v43, %v299_v0  ;;  %vm715_vm9 = vcmp.le.f32.partialorder %v87_v11, 0.7853982 }
  0xc8   :  { %v333_v7 = vadd.s32 %v332_v3, %v323_v31  ;;  %v211_v11 = vsub.s32 4, %v691_v38  ;;  %vm243_vm11 = vcmp.lt.s32.totalorder %v571_v10, 0  ;;  %vm733_vm12 = vcmp.le.f32.partialorder %v241_v13, 0.7853982 }
  0xc9   :  { %v192_v5 = vsel %vm190_vm4, %v191_v46, %v189_v62  ;;  %v311_v21 = vadd.s32 %v310_v18, %v301_v2  ;;  %vm230_vm0 = vweird.f32 %v569_v9  ;;  %vm384_vm4 = vweird.f32 %v571_v10 }
  0xca   :  { %v193_v8 = vclz %v192_v5  ;;  %v337_v48 = vadd.s32 1, %v333_v7  ;;  %v212_v43 = vsel %vm89_vm8, %v211_v11, %v691_v38 }
  0xcb   :  { %vm336_vm5 = vc.u32 %v311_v21, %v330_v6  ;;  %v335_v30 = vadd.s32 %v330_v6, %v311_v21  ;;  %v214_v4 = vsel %vm715_vm9, 0, %v212_v43 }
  0xcc   :  { %v422_v12 = vadd.s32 4294967294, %v193_v8  ;;  %v338_v19 = vsel %vm336_vm5, %v337_v48, %v333_v7  ;;  %v231_v48 = vand.u32 3, %v214_v4 }
  0xcd   :  { %v339_v20 = vadd.s32 %v338_v19, %v334_v14 }
  0xce   :  { %vm423_vm6 = vcmp.lt.s32.totalorder %v422_v12, 0  ;;  %vm233_vm13 = vcmp.eq.s32.totalorder %v231_v48, 0  ;;  %vm236_vm14 = vcmp.eq.s32.totalorder %v231_v48, 2  ;;  %vm232_vm15 = vcmp.lt.s32.totalorder %v231_v48, 2 }
  0xcf   :  { %v196_v33 = vsel %vm423_vm6, 0, %v422_v12  ;;  %v340_v22 = vadd.s32 536870912, %v339_v20 }
  0xd0   :  { %v197_v16 = vsub.s32 32, %v196_v33  ;;  %v201_v17 = vsub.s32 4294967266, %v196_v33  ;;  %v198_v23 = vshll.u32 %v189_v62, %v196_v33 }
  0xd1   :  { %v709_v27 = vshrl.u32 %v340_v22, 30 }
  0xd2   :  { %v199_v25 = vshrl.u32 %v181_v15, %v197_v16  ;;  %v202_v26 = vadd.s32 127, %v201_v17 }
  0xd3   :  { %v342_v35 = vshll.u32 %v709_v27, 30 }
  0xd4   :  { %v200_v29 = vor.u32 %v199_v25, %v198_v23  ;;  %v203_v28 = vshll.u32 %v202_v26, 23  ;;  %v365_v25 = vsub.s32 4, %v709_v27 }
  0xd5   :  { %v343_v36 = vsub.s32 %v339_v20, %v342_v35 }
  0xd6   :  { %v204_v32 = vor.u32 4788187, %v203_v28  ;;  %v207_v39 = vcvt.s32.f32 %v200_v29 }
  0xd7   :  { %vm344_vm7 = vcmp.lt.s32.totalorder %v343_v36, 0  ;;  %v345_v41 = vsub.s32 0, %v343_v36 }
  0xd8   :  { %v205_v37 = vand.u32 2147483647, %v204_v32 }
  0xd9   :  { %v346_v63 = vsel %vm344_vm7, %v345_v41, %v343_v36 }
  0xda   :  { %v208_v42 = vmul.f32 %v207_v39, %v205_v37  ;;  %v347_v49 = vclz %v346_v63  ;;  %v366_v37 = vsel %vm243_vm11, %v365_v25, %v709_v27 }
  0xdc   :  { %v209_v44 = vxor.u32 2147483648, %v208_v42  ;;  %v425_v45 = vadd.s32 4294967294, %v347_v49 }
  0xde   :  { %v210_v24 = vsel %vm89_vm8, %v209_v44, %v208_v42  ;;  %vm426_vm10 = vcmp.lt.s32.totalorder %v425_v45, 0 }
  0xdf   :  { %v213_v51 = vsel %vm715_vm9, %v569_v9, %v210_v24  ;;  %v350_v52 = vsel %vm426_vm10, 0, %v425_v45  ;;  %v368_v9 = vsel %vm733_vm12, 0, %v366_v37 }
  0xe0   :  { %v215_v40 = vmul.f32 %v213_v51, %v213_v51  ;;  %v351_v34 = vsub.s32 32, %v350_v52  ;;  %v355_v54 = vsub.s32 4294967266, %v350_v52  ;;  %v352_v55 = vshll.u32 %v343_v36, %v350_v52 }
  0xe1   :  { %v385_v45 = vand.u32 3, %v368_v9 }
  0xe2   :  { %v223_v53 = vmul.f32 -0.00019511016, %v215_v40  ;;  %v216_v47 = vmul.f32 -0.001358992, %v215_v40  ;;  %v353_v56 = vshrl.u32 %v335_v30, %v351_v34  ;;  %v356_v57 = vadd.s32 127, %v355_v54 }
  0xe3   :  { %vm387_vm1 = vcmp.eq.s32.totalorder %v385_v45, 0  ;;  %vm390_vm2 = vcmp.eq.s32.totalorder %v385_v45, 2  ;;  %vm386_vm3 = vcmp.lt.s32.totalorder %v385_v45, 2 }
  0xe4   :  { %v224_v58 = vadd.f32 0.008332121, %v223_v53  ;;  %v217_v59 = vadd.f32 0.041655596, %v216_v47  ;;  %v354_v60 = vor.u32 %v353_v56, %v352_v55  ;;  %v357_v61 = vshll.u32 %v356_v57, 23 }
  0xe6   :  { %v225_v62 = vmul.f32 %v224_v58, %v215_v40  ;;  %v218_v0 = vmul.f32 %v217_v59, %v215_v40  ;;  %v358_v1 = vor.u32 4788187, %v357_v61  ;;  %v361_v18 = vcvt.s32.f32 %v354_v60 }
  0xe8   :  { %v226_v2 = vadd.f32 -0.16666654, %v225_v62  ;;  %v219_v31 = vadd.f32 -0.4999988, %v218_v0  ;;  %v359_v46 = vand.u32 2147483647, %v358_v1 }
  0xea   :  { %v227_v3 = vmul.f32 %v226_v2, %v215_v40  ;;  %v220_v5 = vmul.f32 %v219_v31, %v215_v40  ;;  %v362_v21 = vmul.f32 %v361_v18, %v359_v46 }
  0xec   :  { %v228_v6 = vadd.f32 1.0, %v227_v3  ;;  %v221_v7 = vadd.f32 1.0, %v220_v5  ;;  %v363_v8 = vxor.u32 2147483648, %v362_v21 }
  0xee   :  { %v229_v12 = vmul.f32 %v228_v6, %v213_v51  ;;  %v237_v14 = vxor.u32 2147483648, %v221_v7  ;;  %v364_v19 = vsel %vm243_vm11, %v363_v8, %v362_v21 }
  0xef   :  { %v367_v20 = vsel %vm733_vm12, %v571_v10, %v364_v19 }
  0xf0   :  { %v234_v33 = vxor.u32 2147483648, %v229_v12  ;;  %v369_v15 = vmul.f32 %v367_v20, %v367_v20  ;;  %v238_v17 = vsel %vm236_vm14, %v237_v14, %v229_v12 }
  0xf2   :  { %v235_v16 = vsel %vm233_vm13, %v221_v7, %v234_v33  ;;  %v377_v22 = vmul.f32 -0.00019511016, %v369_v15  ;;  %v370_v23 = vmul.f32 -0.001358992, %v369_v15 }
  0xf3   :  { %v239_v13 = vsel %vm232_vm15, %v235_v16, %v238_v17 }
  0xf4   :  { %v240_v26 = vsel %vm230_vm0, nan, %v239_v13  ;;  %v378_v29 = vadd.f32 0.008332121, %v377_v22  ;;  %v371_v28 = vadd.f32 0.041655596, %v370_v23 }
  0xf5   :  { %v395_v35 = vmul.f32 0.17677669, %v240_v26 }
  0xf6   :  { %v379_v32 = vmul.f32 %v378_v29, %v369_v15  ;;  %v372_v36 = vmul.f32 %v371_v28, %v369_v15 }
  0xf7   :  { %397 = vst [vmem:[#allocation7] sm:$0xff] %v395_v35 }
  0xf8   :  { %v380_v39 = vadd.f32 -0.16666654, %v379_v32  ;;  %v373_v41 = vadd.f32 -0.4999988, %v372_v36 }
  0xfa   :  { %v381_v42 = vmul.f32 %v380_v39, %v369_v15  ;;  %v374_v63 = vmul.f32 %v373_v41, %v369_v15 }
  0xfc   :  { %v382_v49 = vadd.f32 1.0, %v381_v42  ;;  %v375_v44 = vadd.f32 1.0, %v374_v63 }
  0xfe   :  { %v383_v50 = vmul.f32 %v382_v49, %v367_v20  ;;  %v391_v24 = vxor.u32 2147483648, %v375_v44 }
 0x100   :  { %v388_v51 = vxor.u32 2147483648, %v383_v50  ;;  %v392_v52 = vsel %vm390_vm2, %v391_v24, %v383_v50 }
 0x102   :  { %v389_v40 = vsel %vm387_vm1, %v375_v44, %v388_v51 }
 0x103   :  { %v393_v27 = vsel %vm386_vm3, %v389_v40, %v392_v52 }
 0x104   :  { %v394_v30 = vsel %vm384_vm4, nan, %v393_v27 }
 0x105   :  { %v396_v34 = vmul.f32 0.17677669, %v394_v30 }
 0x107   :  { %398 = vst [vmem:[#allocation7 + $0x8] sm:$0xff] %v396_v34 }
 0x108   :  { %411 = dma.vmem_to_hbm [thread:$0]  %s404_s24, 256, %s406_s27, [#allocation4], %s523_s20, %s523_s20, %s524_s21  }
 0x109   :  { %520 = dma.done.wait [#allocation4], 256  }
 0x10a   :  { %521 = vsyncadd [#allocation4], 4294967040 }
 0x10b   :  { %416 = vsyncpa [#allocation3], 1 }
 0x10c   :  { %417 = vsyncpa [#allocation6], 1 }
 0x10d   :  { %418 = vsyncpa [#allocation4], 1 }

</bundles_post_ra>
